<compile_context>
chip_gen: v6e
topology: v6e:2x2x1
jax: 0.10.0
libtpu: 0.0.40
codegen_flags: <defaults>
</compile_context>

<pallas_src>
import jax
import jax.numpy as jnp
from jax import lax
from jax.experimental import pallas as pl
from jax.experimental.pallas import tpu as pltpu


LANES = 128      # vreg lane width
SUBLANES = 8     # vreg sublane count
DST_GROUP = 8    # destination rows aggregated per vectorized step


def _round_up(x, m):
    return (x + m - 1) // m * m


# ---------------------------------------------------------------------------
# Pallas kernel: all depth iterations of GraphSAGE in one call.
#   per layer k:
#     hw     = ReLU(h @ Wagg^T + b_agg)
#     hn[d]  = max_v adj[d, v] * hw[v]          (dense-mask segment max)
#     h_new  = ReLU(h @ Wself + hn @ Wnbr)      (== ReLU([h|hn] @ Wlin^T))
# h lives in out_ref (constant output block index -> resident across depth).
# ---------------------------------------------------------------------------
def _make_sage_kernel(n_pad, dp):
    n_dst_groups = n_pad // DST_GROUP

    def kernel(x_hbm_ref, adj_ref, waggT_ref, bias_ref, wself_ref, wnbr_ref,
               out_ref,                       # VMEM output == layer-carried h
               hw_ref, hn_ref, dma_sem):      # VMEM scratch + DMA sem
        k = pl.program_id(0)

        # Layer 0: DMA the padded input features straight into the resident
        # output block (which doubles as the h buffer for every layer).
        @pl.when(k == 0)
        def _():
            cp = pltpu.make_async_copy(x_hbm_ref, out_ref, dma_sem.at[0])
            cp.start()
            cp.wait()

        # --- aggregator MLP: hw = ReLU(h @ Wagg^T + b) ----------------------
        hw_ref[...] = jnp.maximum(
            jnp.dot(out_ref[...], waggT_ref[0],
                    preferred_element_type=jnp.float32) + bias_ref[0],
            0.0)

        # --- dense-mask segment max -----------------------------------------
        # hn[d, :] = max_v adj[d, v] * hw[v, :].  adj in {0,1} and hw >= 0, so
        # non-neighbours / isolated nodes naturally give 0 (== scatter-max's
        # zero fill in the reference).  8 destination rows per step, a single
        # full-vreg store per group; the source loop is statically unrolled so
        # every lane access has a compile-time offset.
        # TODO(synk): for large graphs use a dynamic 128-wide source-tile loop
        #             to bound code size.
        @pl.loop(0, n_dst_groups)
        def _(g):
            r0 = pl.multiple_of(g * DST_GROUP, DST_GROUP)
            acc = jnp.zeros((DST_GROUP, dp), jnp.float32)
            for v in range(n_pad):                                  # static
                mcol = adj_ref[pl.ds(r0, DST_GROUP), pl.ds(v, 1)]   # [8, 1]
                hrow = hw_ref[pl.ds(v, 1), :]                       # [1, dp]
                acc = jnp.maximum(acc, mcol * hrow)                 # [8, dp]
            hn_ref[pl.ds(r0, DST_GROUP), :] = acc    # one full-vreg store/group

        # --- combine paths: h_new = ReLU(h @ Wself + hn @ Wnbr) -------------
        # Self path recomputed here (h still resident in out_ref) so nothing
        # big stays live in vregs across the aggregation loop.
        out_ref[...] = jnp.maximum(
            jnp.dot(out_ref[...], wself_ref[0],
                    preferred_element_type=jnp.float32)
            + jnp.dot(hn_ref[...], wnbr_ref[0],
                      preferred_element_type=jnp.float32),
            0.0)

    return kernel


# ---------------------------------------------------------------------------
# Wrapper-side preparation (hoisted out of the depth loop).
# ---------------------------------------------------------------------------
def _prepare_weights(unique_params, dp):
    """Pad per-layer weights to [dp, dp] / [1, dp] and stack the unique sets."""
    waggT_l, bias_l, wself_l, wnbr_l = [], [], [], []
    for wagg, bagg, wlin in unique_params:
        d_in = wagg.shape[1]
        d_out = wlin.shape[0]
        wlin_t = wlin.T                       # [2*d_in, d_out]
        wself = wlin_t[:d_in]                 # acts on h
        wnbr = wlin_t[d_in:]                  # acts on hn
        waggT_l.append(jnp.zeros((dp, dp), jnp.float32)
                       .at[:d_in, :d_in].set(wagg.T))
        wself_l.append(jnp.zeros((dp, dp), jnp.float32)
                       .at[:d_in, :d_out].set(wself))
        wnbr_l.append(jnp.zeros((dp, dp), jnp.float32)
                      .at[:d_in, :d_out].set(wnbr))
        bias_l.append(jnp.zeros((1, dp), jnp.float32).at[0, :d_in].set(bagg))
    return (jnp.stack(waggT_l), jnp.stack(bias_l),
            jnp.stack(wself_l), jnp.stack(wnbr_l))


def _build_dense_adjacency(u, v, n_nodes, n_pad):
    """Dense {0,1} mask: adj[dst, src] = 1 for each edge (u=dst, v=src)."""
    u = jnp.clip(u.astype(jnp.int32), 0, n_nodes - 1)
    v = jnp.clip(v.astype(jnp.int32), 0, n_nodes - 1)
    adj = jnp.zeros((n_pad, n_pad), jnp.float32)
    return adj.at[u, v].set(1.0)


# ---------------------------------------------------------------------------
# Module-level wrapper (parameter plumbing + single fused pallas_call).
# ---------------------------------------------------------------------------
def init_graphsage_params(key, sz_in, sz_out, dim_i, depth):
    """Deterministic params in torch nn.Linear layout ([out, in], bias [out]).
    Layers 1..depth-1 share weights, exactly like the torch ModuleList."""
    ks = jax.random.split(key, 6)
    scale = 0.1
    lin0 = scale * jax.random.normal(ks[0], (dim_i, 2 * sz_in), jnp.float32)
    lin_rest = scale * jax.random.normal(ks[1], (sz_out, 2 * dim_i), jnp.float32)
    agg0_w = scale * jax.random.normal(ks[2], (sz_in, sz_in), jnp.float32)
    agg0_b = scale * jax.random.normal(ks[3], (sz_in,), jnp.float32)
    aggr_w = scale * jax.random.normal(ks[4], (dim_i, dim_i), jnp.float32)
    aggr_b = scale * jax.random.normal(ks[5], (dim_i,), jnp.float32)

    params = []
    for k in range(depth):
        if k == 0:
            params.append((agg0_w, agg0_b, lin0))
        else:
            params.append((aggr_w, aggr_b, lin_rest))
    return params


def graphsage_forward(x, edge_index, params, depth):
    """Pallas-backed GraphSAGELayer.forward (agg='max', concat=True,
    dropout=0, normalize=False, training mode)."""
    n_nodes, sz_in = x.shape
    d_out_last = params[-1][2].shape[0]

    # One padded lane width shared by all layers (all test dims <= 128).
    # TODO(synk): per-layer padding when layer widths are heterogeneous > 128.
    dims = [sz_in] + [p[2].shape[0] for p in params]
    dp = _round_up(max(max(dims), LANES), LANES)
    n_pad = _round_up(max(n_nodes, SUBLANES), SUBLANES)

    adj = _build_dense_adjacency(edge_index[0], edge_index[1], n_nodes, n_pad)

    # Layers 1..depth-1 share one weight set in the torch module, so stream
    # only the unique sets and reuse the k >= 1 slot via the index map.
    unique_params = list(params[:min(depth, 2)])
    n_u = len(unique_params)
    waggT_all, bias_all, wself_all, wnbr_all = _prepare_weights(unique_params, dp)

    x_pad = jnp.zeros((n_pad, dp), jnp.float32).at[:n_nodes, :sz_in].set(
        x.astype(jnp.float32))

    kernel = _make_sage_kernel(n_pad, dp)
    w_idx = lambda k: (jnp.minimum(k, n_u - 1), 0, 0)   # dedup weight streaming

    out_pad = pl.pallas_call(
        kernel,
        out_shape=jax.ShapeDtypeStruct((n_pad, dp), jnp.float32),
        grid_spec=pltpu.PrefetchScalarGridSpec(
            num_scalar_prefetch=0,
            grid=(depth,),
            in_specs=[
                pl.BlockSpec(memory_space=pl.ANY),                  # x (HBM)
                pl.BlockSpec((n_pad, n_pad), lambda k: (0, 0)),     # adj mask
                pl.BlockSpec((1, dp, dp), w_idx),                   # Wagg^T
                pl.BlockSpec((1, 1, dp), w_idx),                    # b_agg
                pl.BlockSpec((1, dp, dp), w_idx),                   # Wself
                pl.BlockSpec((1, dp, dp), w_idx),                   # Wnbr
            ],
            out_specs=pl.BlockSpec((n_pad, dp), lambda k: (0, 0)),  # resident h
            scratch_shapes=[
                pltpu.VMEM((n_pad, dp), jnp.float32),   # hw
                pltpu.VMEM((n_pad, dp), jnp.float32),   # hn
                pltpu.SemaphoreType.DMA((1,)),          # x -> out_ref DMA
            ],
        ),
        compiler_params=pltpu.CompilerParams(
            dimension_semantics=("arbitrary",)),        # depth is sequential
    )(x_pad, adj, waggT_all, bias_all, wself_all, wnbr_all)

    return out_pad[:n_nodes, :d_out_last]


# ---------------------------------------------------------------------------
# Pure-JAX reference (matches the torch semantics) for verification.
# ---------------------------------------------------------------------------
def graphsage_reference(x, edge_index, params, depth):
    u = edge_index[0]
    v = edge_index[1]
    n = x.shape[0]
    h = x
    for k in range(depth):
        wagg, bagg, wlin = params[k]
        hw = jax.nn.relu(h @ wagg.T + bagg)
        msg = hw[v]
        hn = jax.ops.segment_max(msg, u, num_segments=n)
        hn = jnp.maximum(hn, 0.0)                # zero identity for empty groups
        h_cat = jnp.concatenate([h, hn], axis=1)
        h = jax.nn.relu(h_cat @ wlin.T)
    return h


if __name__ == "__main__":
    # Small, deterministic problem: N nodes, sz_in features, max-aggregator,
    # concat=True, depth=2  ->  output [N, sz_out].
    N, SZ_IN, DIM_I, SZ_OUT, DEPTH = 8, 16, 32, 8, 2

    key = jax.random.PRNGKey(0)
    kx, ku, kv, kp = jax.random.split(key, 4)

    x = jax.random.normal(kx, (N, SZ_IN), jnp.float32)

    # Edge list: one self-loop per node (so every node has an incoming edge)
    # plus N random edges.
    u_extra = jax.random.randint(ku, (N,), 0, N, jnp.int32)
    v_extra = jax.random.randint(kv, (N,), 0, N, jnp.int32)
    u = jnp.concatenate([jnp.arange(N, dtype=jnp.int32), u_extra])
    v = jnp.concatenate([jnp.arange(N, dtype=jnp.int32), v_extra])
    edge_index = jnp.stack([u, v])               # [2, num_edges]

    params = init_graphsage_params(kp, SZ_IN, SZ_OUT, DIM_I, DEPTH)

    out = graphsage_forward(x, edge_index, params, DEPTH)
    out = jax.block_until_ready(out)

    ref = graphsage_reference(x, edge_index, params, DEPTH)
    assert out.shape == (N, SZ_OUT), out.shape
    assert jnp.allclose(out, ref, atol=1e-5, rtol=1e-5), (
        f"max abs err = {jnp.max(jnp.abs(out - ref))}")

    print("KERNEL_OK")
</pallas_src>

<mosaic_0001>
module attributes {stable_mosaic.version = 11 : i64} {
  func.func @kernel(%arg0: i32, %arg1: memref<8x128xf32, #tpu.memory_space<any>>, %arg2: memref<8x8xf32, #tpu.memory_space<vmem>>, %arg3: memref<1x128x128xf32, #tpu.memory_space<vmem>>, %arg4: memref<1x1x128xf32, #tpu.memory_space<vmem>>, %arg5: memref<1x128x128xf32, #tpu.memory_space<vmem>>, %arg6: memref<1x128x128xf32, #tpu.memory_space<vmem>>, %arg7: memref<8x128xf32, #tpu.memory_space<vmem>>, %arg8: memref<8x128xf32, #tpu.memory_space<vmem>>, %arg9: memref<8x128xf32, #tpu.memory_space<vmem>>, %arg10: memref<1x!tpu.dma_semaphore, #tpu.memory_space<semaphore_mem>>) attributes {dimension_semantics = [#tpu.dimension_semantics<arbitrary>], iteration_bounds = array<i64: 2>, scalar_prefetch = 0 : i64, scratch_operands = 3 : i64, tpu.core_type = #tpu.core_type<tc>, window_params = [{}, {pipeline_mode = #tpu.pipeline_mode<synchronous>, transform_indices = @transform_1, window_bounds = array<i64: 8, 8>}, {transform_indices = @transform_2, window_bounds = array<i64: 1, 128, 128>}, {transform_indices = @transform_3, window_bounds = array<i64: 1, 1, 128>}, {transform_indices = @transform_4, window_bounds = array<i64: 1, 128, 128>}, {transform_indices = @transform_5, window_bounds = array<i64: 1, 128, 128>}, {pipeline_mode = #tpu.pipeline_mode<synchronous>, transform_indices = @transform_6, window_bounds = array<i64: 8, 128>}]} {
    %c0_i32 = arith.constant 0 : i32
    %0 = arith.cmpi eq, %arg0, %c0_i32 : i32
    %1 = arith.extui %0 : i1 to i32
    %c0_i32_0 = arith.constant 0 : i32
    %2 = arith.cmpi ne, %1, %c0_i32_0 : i32
    scf.if %2 {
      %c0_i32_48 = arith.constant 0 : i32
      %89 = tpu.memref_slice %arg10[%c0_i32_48] : memref<1x!tpu.dma_semaphore, #tpu.memory_space<semaphore_mem>> -> memref<1x!tpu.dma_semaphore, #tpu.memory_space<semaphore_mem>>
      %90 = tpu.memref_squeeze %89 : memref<1x!tpu.dma_semaphore, #tpu.memory_space<semaphore_mem>> -> memref<!tpu.dma_semaphore, #tpu.memory_space<semaphore_mem>>
      tpu.enqueue_dma source(%arg1 : memref<8x128xf32, #tpu.memory_space<any>>) target(%arg7 : memref<8x128xf32, #tpu.memory_space<vmem>>) target_semaphore(%90 : memref<!tpu.dma_semaphore, #tpu.memory_space<semaphore_mem>>)
      %c0_i32_49 = arith.constant 0 : i32
      %91 = tpu.memref_slice %arg10[%c0_i32_49] : memref<1x!tpu.dma_semaphore, #tpu.memory_space<semaphore_mem>> -> memref<1x!tpu.dma_semaphore, #tpu.memory_space<semaphore_mem>>
      %92 = tpu.memref_squeeze %91 : memref<1x!tpu.dma_semaphore, #tpu.memory_space<semaphore_mem>> -> memref<!tpu.dma_semaphore, #tpu.memory_space<semaphore_mem>>
      tpu.wait_dma2 semaphore(%92 : memref<!tpu.dma_semaphore, #tpu.memory_space<semaphore_mem>>) src(%arg1 : memref<8x128xf32, #tpu.memory_space<any>>) dst(%arg7 : memref<8x128xf32, #tpu.memory_space<vmem>>)
    } else {
    }
    %c0 = arith.constant 0 : index
    %c0_1 = arith.constant 0 : index
    %3 = vector.load %arg7[%c0, %c0_1] : memref<8x128xf32, #tpu.memory_space<vmem>>, vector<8x128xf32>
    %c0_2 = arith.constant 0 : index
    %c0_3 = arith.constant 0 : index
    %c0_4 = arith.constant 0 : index
    %4 = vector.load %arg3[%c0_2, %c0_3, %c0_4] : memref<1x128x128xf32, #tpu.memory_space<vmem>>, vector<1x128x128xf32>
    %5 = vector.shape_cast %4 : vector<1x128x128xf32> to vector<128x128xf32>
    %cst = arith.constant dense<0.000000e+00> : vector<8x128xf32>
    %6 = tpu.matmul %3, %5, %cst {dimension_numbers = #tpu.dot_dimension_numbers<[1], [0], [0], [1], [0, 0, 1, 1], [], []>} : vector<8x128xf32>, vector<128x128xf32>, vector<8x128xf32> -> vector<8x128xf32>
    %c0_5 = arith.constant 0 : index
    %c0_6 = arith.constant 0 : index
    %c0_7 = arith.constant 0 : index
    %7 = vector.load %arg4[%c0_5, %c0_6, %c0_7] : memref<1x1x128xf32, #tpu.memory_space<vmem>>, vector<1x1x128xf32>
    %8 = vector.shape_cast %7 : vector<1x1x128xf32> to vector<1x128xf32>
    %9 = vector.broadcast %8 : vector<1x128xf32> to vector<8x128xf32>
    %10 = arith.addf %6, %9 : vector<8x128xf32>
    %cst_8 = arith.constant 0.000000e+00 : f32
    %11 = vector.broadcast %cst_8 : f32 to vector<8x128xf32>
    %12 = arith.maximumf %10, %11 : vector<8x128xf32>
    %c0_9 = arith.constant 0 : index
    %c0_10 = arith.constant 0 : index
    %13 = vector.load %arg8[%c0_9, %c0_10] : memref<8x128xf32, #tpu.memory_space<vmem>>, vector<8x128xf32>
    tpu.vector_store %arg8[%c0_9, %c0_10], %12 {strides = array<i32>} : memref<8x128xf32, #tpu.memory_space<vmem>>, vector<8x128xf32>,
    %c0_i32_11 = arith.constant 0 : i32
    %c1_i32 = arith.constant 1 : i32
    %14 = arith.muli %c0_i32_11, %c1_i32 : i32
    %c0_i32_12 = arith.constant 0 : i32
    %15 = arith.addi %c0_i32_12, %14 : i32
    %c8_i32 = arith.constant 8 : i32
    %16 = arith.muli %15, %c8_i32 : i32
    %17 = tpu.assume_multiple %16, 8 : i32
    %cst_13 = arith.constant 0.000000e+00 : f32
    %18 = vector.broadcast %cst_13 : f32 to vector<8x128xf32>
    %19 = arith.index_cast %17 : i32 to index
    %c0_14 = arith.constant 0 : index
    %20 = vector.load %arg2[%19, %c0_14] : memref<8x8xf32, #tpu.memory_space<vmem>>, vector<8x1xf32>
    %c0_15 = arith.constant 0 : index
    %c0_16 = arith.constant 0 : index
    %21 = vector.load %arg8[%c0_15, %c0_16] : memref<8x128xf32, #tpu.memory_space<vmem>>, vector<1x128xf32>
    %22 = vector.broadcast %20 : vector<8x1xf32> to vector<8x128xf32>
    %23 = vector.broadcast %21 : vector<1x128xf32> to vector<8x128xf32>
    %24 = arith.mulf %22, %23 : vector<8x128xf32>
    %25 = arith.maximumf %18, %24 : vector<8x128xf32>
    %26 = arith.index_cast %17 : i32 to index
    %c1 = arith.constant 1 : index
    %27 = vector.load %arg2[%26, %c1] : memref<8x8xf32, #tpu.memory_space<vmem>>, vector<8x1xf32>
    %c1_17 = arith.constant 1 : index
    %c0_18 = arith.constant 0 : index
    %28 = vector.load %arg8[%c1_17, %c0_18] : memref<8x128xf32, #tpu.memory_space<vmem>>, vector<1x128xf32>
    %29 = vector.broadcast %27 : vector<8x1xf32> to vector<8x128xf32>
    %30 = vector.broadcast %28 : vector<1x128xf32> to vector<8x128xf32>
    %31 = arith.mulf %29, %30 : vector<8x128xf32>
    %32 = arith.maximumf %25, %31 : vector<8x128xf32>
    %33 = arith.index_cast %17 : i32 to index
    %c2 = arith.constant 2 : index
    %34 = vector.load %arg2[%33, %c2] : memref<8x8xf32, #tpu.memory_space<vmem>>, vector<8x1xf32>
    %c2_19 = arith.constant 2 : index
    %c0_20 = arith.constant 0 : index
    %35 = vector.load %arg8[%c2_19, %c0_20] : memref<8x128xf32, #tpu.memory_space<vmem>>, vector<1x128xf32>
    %36 = vector.broadcast %34 : vector<8x1xf32> to vector<8x128xf32>
    %37 = vector.broadcast %35 : vector<1x128xf32> to vector<8x128xf32>
    %38 = arith.mulf %36, %37 : vector<8x128xf32>
    %39 = arith.maximumf %32, %38 : vector<8x128xf32>
    %40 = arith.index_cast %17 : i32 to index
    %c3 = arith.constant 3 : index
    %41 = vector.load %arg2[%40, %c3] : memref<8x8xf32, #tpu.memory_space<vmem>>, vector<8x1xf32>
    %c3_21 = arith.constant 3 : index
    %c0_22 = arith.constant 0 : index
    %42 = vector.load %arg8[%c3_21, %c0_22] : memref<8x128xf32, #tpu.memory_space<vmem>>, vector<1x128xf32>
    %43 = vector.broadcast %41 : vector<8x1xf32> to vector<8x128xf32>
    %44 = vector.broadcast %42 : vector<1x128xf32> to vector<8x128xf32>
    %45 = arith.mulf %43, %44 : vector<8x128xf32>
    %46 = arith.maximumf %39, %45 : vector<8x128xf32>
    %47 = arith.index_cast %17 : i32 to index
    %c4 = arith.constant 4 : index
    %48 = vector.load %arg2[%47, %c4] : memref<8x8xf32, #tpu.memory_space<vmem>>, vector<8x1xf32>
    %c4_23 = arith.constant 4 : index
    %c0_24 = arith.constant 0 : index
    %49 = vector.load %arg8[%c4_23, %c0_24] : memref<8x128xf32, #tpu.memory_space<vmem>>, vector<1x128xf32>
    %50 = vector.broadcast %48 : vector<8x1xf32> to vector<8x128xf32>
    %51 = vector.broadcast %49 : vector<1x128xf32> to vector<8x128xf32>
    %52 = arith.mulf %50, %51 : vector<8x128xf32>
    %53 = arith.maximumf %46, %52 : vector<8x128xf32>
    %54 = arith.index_cast %17 : i32 to index
    %c5 = arith.constant 5 : index
    %55 = vector.load %arg2[%54, %c5] : memref<8x8xf32, #tpu.memory_space<vmem>>, vector<8x1xf32>
    %c5_25 = arith.constant 5 : index
    %c0_26 = arith.constant 0 : index
    %56 = vector.load %arg8[%c5_25, %c0_26] : memref<8x128xf32, #tpu.memory_space<vmem>>, vector<1x128xf32>
    %57 = vector.broadcast %55 : vector<8x1xf32> to vector<8x128xf32>
    %58 = vector.broadcast %56 : vector<1x128xf32> to vector<8x128xf32>
    %59 = arith.mulf %57, %58 : vector<8x128xf32>
    %60 = arith.maximumf %53, %59 : vector<8x128xf32>
    %61 = arith.index_cast %17 : i32 to index
    %c6 = arith.constant 6 : index
    %62 = vector.load %arg2[%61, %c6] : memref<8x8xf32, #tpu.memory_space<vmem>>, vector<8x1xf32>
    %c6_27 = arith.constant 6 : index
    %c0_28 = arith.constant 0 : index
    %63 = vector.load %arg8[%c6_27, %c0_28] : memref<8x128xf32, #tpu.memory_space<vmem>>, vector<1x128xf32>
    %64 = vector.broadcast %62 : vector<8x1xf32> to vector<8x128xf32>
    %65 = vector.broadcast %63 : vector<1x128xf32> to vector<8x128xf32>
    %66 = arith.mulf %64, %65 : vector<8x128xf32>
    %67 = arith.maximumf %60, %66 : vector<8x128xf32>
    %68 = arith.index_cast %17 : i32 to index
    %c7 = arith.constant 7 : index
    %69 = vector.load %arg2[%68, %c7] : memref<8x8xf32, #tpu.memory_space<vmem>>, vector<8x1xf32>
    %c7_29 = arith.constant 7 : index
    %c0_30 = arith.constant 0 : index
    %70 = vector.load %arg8[%c7_29, %c0_30] : memref<8x128xf32, #tpu.memory_space<vmem>>, vector<1x128xf32>
    %71 = vector.broadcast %69 : vector<8x1xf32> to vector<8x128xf32>
    %72 = vector.broadcast %70 : vector<1x128xf32> to vector<8x128xf32>
    %73 = arith.mulf %71, %72 : vector<8x128xf32>
    %74 = arith.maximumf %67, %73 : vector<8x128xf32>
    %75 = arith.index_cast %17 : i32 to index
    %c0_31 = arith.constant 0 : index
    %76 = vector.load %arg9[%75, %c0_31] : memref<8x128xf32, #tpu.memory_space<vmem>>, vector<8x128xf32>
    tpu.vector_store %arg9[%75, %c0_31], %74 {strides = array<i32>} : memref<8x128xf32, #tpu.memory_space<vmem>>, vector<8x128xf32>,
    %c1_i32_32 = arith.constant 1 : i32
    %c0_33 = arith.constant 0 : index
    %c0_34 = arith.constant 0 : index
    %77 = vector.load %arg7[%c0_33, %c0_34] : memref<8x128xf32, #tpu.memory_space<vmem>>, vector<8x128xf32>
    %c0_35 = arith.constant 0 : index
    %c0_36 = arith.constant 0 : index
    %c0_37 = arith.constant 0 : index
    %78 = vector.load %arg5[%c0_35, %c0_36, %c0_37] : memref<1x128x128xf32, #tpu.memory_space<vmem>>, vector<1x128x128xf32>
    %79 = vector.shape_cast %78 : vector<1x128x128xf32> to vector<128x128xf32>
    %cst_38 = arith.constant dense<0.000000e+00> : vector<8x128xf32>
    %80 = tpu.matmul %77, %79, %cst_38 {dimension_numbers = #tpu.dot_dimension_numbers<[1], [0], [0], [1], [0, 0, 1, 1], [], []>} : vector<8x128xf32>, vector<128x128xf32>, vector<8x128xf32> -> vector<8x128xf32>
    %c0_39 = arith.constant 0 : index
    %c0_40 = arith.constant 0 : index
    %81 = vector.load %arg9[%c0_39, %c0_40] : memref<8x128xf32, #tpu.memory_space<vmem>>, vector<8x128xf32>
    %c0_41 = arith.constant 0 : index
    %c0_42 = arith.constant 0 : index
    %c0_43 = arith.constant 0 : index
    %82 = vector.load %arg6[%c0_41, %c0_42, %c0_43] : memref<1x128x128xf32, #tpu.memory_space<vmem>>, vector<1x128x128xf32>
    %83 = vector.shape_cast %82 : vector<1x128x128xf32> to vector<128x128xf32>
    %cst_44 = arith.constant dense<0.000000e+00> : vector<8x128xf32>
    %84 = tpu.matmul %81, %83, %cst_44 {dimension_numbers = #tpu.dot_dimension_numbers<[1], [0], [0], [1], [0, 0, 1, 1], [], []>} : vector<8x128xf32>, vector<128x128xf32>, vector<8x128xf32> -> vector<8x128xf32>
    %85 = arith.addf %80, %84 : vector<8x128xf32>
    %cst_45 = arith.constant 0.000000e+00 : f32
    %86 = vector.broadcast %cst_45 : f32 to vector<8x128xf32>
    %87 = arith.maximumf %85, %86 : vector<8x128xf32>
    %c0_46 = arith.constant 0 : index
    %c0_47 = arith.constant 0 : index
    %88 = vector.load %arg7[%c0_46, %c0_47] : memref<8x128xf32, #tpu.memory_space<vmem>>, vector<8x128xf32>
    tpu.vector_store %arg7[%c0_46, %c0_47], %87 {strides = array<i32>} : memref<8x128xf32, #tpu.memory_space<vmem>>, vector<8x128xf32>,
    return
  }
  func.func @transform_1(%arg0: i32) -> (i32, i32) {
    %c0_i32 = arith.constant 0 : i32
    %c0_i32_0 = arith.constant 0 : i32
    %c0_i32_1 = arith.constant 0 : i32
    return %c0_i32, %c0_i32_0 : i32, i32
  }
  func.func @transform_2(%arg0: i32) -> (i32, i32, i32) {
    %c1_i32 = arith.constant 1 : i32
    %0 = arith.minsi %arg0, %c1_i32 : i32
    %c0_i32 = arith.constant 0 : i32
    %c0_i32_0 = arith.constant 0 : i32
    %c0_i32_1 = arith.constant 0 : i32
    return %0, %c0_i32, %c0_i32_0 : i32, i32, i32
  }
  func.func @transform_3(%arg0: i32) -> (i32, i32, i32) {
    %c1_i32 = arith.constant 1 : i32
    %0 = arith.minsi %arg0, %c1_i32 : i32
    %c0_i32 = arith.constant 0 : i32
    %c0_i32_0 = arith.constant 0 : i32
    %c0_i32_1 = arith.constant 0 : i32
    return %0, %c0_i32, %c0_i32_0 : i32, i32, i32
  }
  func.func @transform_4(%arg0: i32) -> (i32, i32, i32) {
    %c1_i32 = arith.constant 1 : i32
    %0 = arith.minsi %arg0, %c1_i32 : i32
    %c0_i32 = arith.constant 0 : i32
    %c0_i32_0 = arith.constant 0 : i32
    %c0_i32_1 = arith.constant 0 : i32
    return %0, %c0_i32, %c0_i32_0 : i32, i32, i32
  }
  func.func @transform_5(%arg0: i32) -> (i32, i32, i32) {
    %c1_i32 = arith.constant 1 : i32
    %0 = arith.minsi %arg0, %c1_i32 : i32
    %c0_i32 = arith.constant 0 : i32
    %c0_i32_0 = arith.constant 0 : i32
    %c0_i32_1 = arith.constant 0 : i32
    return %0, %c0_i32, %c0_i32_0 : i32, i32, i32
  }
  func.func @transform_6(%arg0: i32) -> (i32, i32) {
    %c0_i32 = arith.constant 0 : i32
    %c0_i32_0 = arith.constant 0 : i32
    %c0_i32_1 = arith.constant 0 : i32
    return %c0_i32, %c0_i32_0 : i32, i32
  }
}

</mosaic_0001>

<bundles_post_ra>
// kernel: tpu_custom_call.1
= control target key start
LH: loop header
LB: loop body
LE: loop exit
PB: predicated region body
PF: predicated region fallthrough
CT: control target
= control target key end

     0   :  { %s1816_s0 = inlined_call_operand.hbm [shape: f32[8,128], index: 0, kind: input, shape index: {}]   ;;  %s1817_s1 = inlined_call_operand.hbm [shape: f32[8,8], index: 1, kind: input, shape index: {}]   ;;  %s1818_s2 = inlined_call_operand.hbm [shape: f32[2,128,128], index: 2, kind: input, shape index: {}]   ;;  %s1819_s3 = inlined_call_operand.vmem [shape: f32[2,1,128], index: 3, kind: input, shape index: {}]   ;;  %s1820_s4 = inlined_call_operand.hbm [shape: f32[2,128,128], index: 4, kind: input, shape index: {}]   ;;  %s1821_s5 = inlined_call_operand.hbm [shape: f32[2,128,128], index: 5, kind: input, shape index: {}]   ;;  %s1822_s6 = inlined_call_operand.hbm [shape: f32[8,128], index: 6, kind: output, shape index: {}]  }
   0x1   :  { %1832 = sst [smem:[#allocation24_spill]] %s1818_s2 }
   0x2   :  { %11 = vsyncpa [#allocation6], 0 }
   0x3   :  { %12 = vsyncpa [#allocation9], 0 }
   0x4   :  { %14 = vsyncpa [#allocation9 + $0x1], 0 }
   0x5   :  { %15 = vsyncpa [#allocation12], 0 }
   0x6   :  { %17 = vsyncpa [#allocation12 + $0x1], 0 }
   0x7   :  { %18 = vsyncpa [#allocation7], 0  ;;  %s1431_s21 = smov 0   ;;  %s1433_s22 = smov 0  }
   0x8   :  { %s1435_s23 = smov 0   ;;  %s1437_s24 = smov 0  }
   0x9 LB: > { %s1452_s25 = sadd.s32 1, %s1377_s24   ;;  %p49_p0 = scmp.lt.s32.totalorder %s1377_s24, 1  ;;  %s1377_s24 = sphi %s1437_s24, %s1857_s24   ;;  %s1373_s23 = sphi %s1435_s23, %s1856_s23   ;;  %s1369_s22 = sphi %s1433_s22, %s1855_s22   ;;  %s1365_s21 = sphi %s1431_s21, %s1854_s21  }
   0xa   : > { %p51_p1 = scmp.lt.s32.totalorder %s1452_s25, 1  ;;  %s56_s26 = sadd.s32 1, %s1373_s23 }
   0xb   : > { %s50_s27 = scalar_select %p49_p0, %s1377_s24, 1 }
   0xc   : > { %s52_s28 = scalar_select %p51_p1, %s1452_s25, 1 }
   0xd   : > { %p63_p2 = scmp.ne.s32.totalorder %s1373_s23, %s1369_s22  ;;  %p64_p3 = scmp.eq.s32.totalorder %s1377_s24, 0 }
   0xe   : > { %s53_s29 = ssub.s32 %s50_s27, %s52_s28  ;;  %p1109_p6 = scmp.lt.s32.totalorder %s1377_s24, 2 }
   0xf   : > { %p54_p4 = scmp.eq.s32.totalorder %s53_s29, 0  ;;  %p65_p5 = por %p64_p3, %p63_p2 }
  0x10   : > { %s215_s30 = sand.u32 1, %s1377_s24   ;;  %s1823_s8 = sand.u32 1, %s1373_s23  }
  0x11   : > { %s1465_s7 = scalar_select %p54_p4, %s1373_s23, %s56_s26  }
  0x12   : > { %s1470_s9 = sshll.u32 %s1823_s8, 7  ;;  %s1472_s10 = sshll.u32 %s50_s27, 11 }
  0x13   : > { %1833 = sst [smem:[#allocation23_spill]] %s1465_s7  ;;  %s219_s14 = scalar_lea.vmem [#allocation8], %s1470_s9 }
  0x14   : > { %s1834_s2 = sld [smem:[#allocation24_spill]]  ;;  %s228_s15 = sshll.u32 %s219_s14, 4  ;;  %s1485_s15 = int_to_ptr.vmem [resolvable:$true] %s228_s15 }
  0x15   : > { %p1481_p7 = pnand %p1109_p6, %p65_p5  ;;  %s1487_s17 = scalar_lea.sflag [#allocation9], %s215_s30 }
  0x17   : > { %p1493_p9 = pneg %p1481_p7 }
  0x1a   : > { %s1478_s13 = scalar_lea.hbm %s1834_s2, %s1472_s10  ;;  %s1174_s27 = scalar_lea.hbm %s1834_s2, 4096 }
  0x1b   : > { %s1169_s18 = scalar_lea.hbm %s1478_s13, 2048  ;;  %p1175_p12 = scmp.lt.s32.totalorder %s1478_s13, %s1834_s2 }
  0x1c   : > { %p1170_p8 = scmp.ne.s32.totalorder %s1478_s13, %s1169_s18  ;;  %p1176_p13 = scmp.lt.s32.totalorder %s1174_s27, %s1169_s18 }
  0x1e   : > { %p1172_p10 = pnand %p1493_p9, %p1170_p8  ;;  %p1177_p0 = por %p1176_p13, %p1175_p12 }
  0x20   : > { %p1173_p11 = pneg %p1172_p10 }
  0x22   : > { %p1178_p1 = pnand %p1177_p0, %p1173_p11 }
  0x24   : > { %1181 = shalt.err (!%p1178_p1)
}
  0x25   : > { %s1182_s30 = scalar_lea.vmem %s1485_s15, 2048  ;;  %s1379_s11 = smov [#allocation8]  }
  0x26   : > { %p1183_p2 = scmp.ne.s32.totalorder %s1485_s15, %s1182_s30  ;;  %s1187_s12 = sshll.u32 %s1379_s11, 4  ;;  %s1188_s12 = int_to_ptr.vmem [resolvable:$false] %s1187_s12 }
  0x27   : > { %s1189_s14 = scalar_lea.vmem %s1188_s12, 4096  ;;  %p1190_p5 = scmp.lt.s32.totalorder %s1485_s15, %s1188_s12 }
  0x28   : > { %p1185_p3 = pnand %p1183_p2, %p1493_p9  ;;  %p1191_p6 = scmp.lt.s32.totalorder %s1189_s14, %s1182_s30 }
  0x2a   : > { %p1186_p4 = pneg %p1185_p3  ;;  %p1192_p8 = por %p1191_p6, %p1190_p5 }
  0x2c   : > { %p1193_p10 = pnand %p1192_p8, %p1186_p4 }
  0x2e   : > { %1196 = shalt.err (!%p1193_p10)
}
  0x2f   : > { %s1824_s18 = smov 128   ;;  %s1828_s20 = smov 8  }
  0x30   : > { %1101 = dma.hbm_to_vmem [thread:$0]  (!%p1481_p7), %s1478_s13, 2048, %s1485_s15, %s1487_s17, %s1824_s18, %s1824_s18, %s1828_s20  }
  0x31   : > { %s1520_s26 = sadd.s32 4294967295, %s1377_s24   ;;  %p69_p12 = scmp.ne.s32.totalorder %s1369_s22, %s1365_s21 }
  0x32   : > { %p1826_p11 = scmp.eq.s32.totalorder %s1520_s26, 0  ;;  %p883_p13 = scmp.ge.s32.totalorder %s1377_s24, 1 }
  0x33   : > { %p191_p0 = scmp.lt.s32.totalorder %s1377_s24, 3  ;;  %s1382_s13 = smov [#allocation5]  }
  0x34   : > { %p1529_p1 = por %p1826_p11, %p69_p12  ;;  %s204_s15 = sshll.u32 %s1382_s13, 4  ;;  %s1537_s15 = int_to_ptr.vmem [resolvable:$true] %s204_s15 }
  0x35   : > { %p1533_p2 = pnand %p883_p13, %p191_p0  ;;  %s1545_s24 = scalar_lea.hbm %s1820_s4, %s1472_s10 }
  0x36   : > { %s1837_s27 = scalar_select %p1529_p1, 1, 0 }
  0x37   : > { %s1838_s28 = scalar_select %p1533_p2, 1, 0 }
  0x38   : > { %p1094_p3 = pneg %p1533_p2  ;;  %s252_s30 = scalar_lea.vmem [#allocation10], %s1470_s9 }
  0x39   : > { %s261_s11 = sshll.u32 %s252_s30, 4  ;;  %s1197_s14 = scalar_lea.hbm %s1545_s24, 2048  ;;  %s262_s11 = int_to_ptr.vmem [resolvable:$true] %s261_s11 }
  0x3a   : > { %p1550_p4 = pnand %p1094_p3, %p1826_p11  ;;  %p1198_p5 = scmp.ne.s32.totalorder %s1545_s24, %s1197_s14 }
  0x3b   : > { %s1202_s29 = scalar_lea.hbm %s1820_s4, 4096  ;;  %p1203_p10 = scmp.lt.s32.totalorder %s1545_s24, %s1820_s4 }
  0x3c   : > { %s1839_s12 = scalar_select %p1550_p4, 1, 0 }
  0x3d   : > { %p1200_p6 = pnand %p1198_p5, %p1493_p9  ;;  %p1204_p12 = scmp.lt.s32.totalorder %s1202_s29, %s1197_s14 }
  0x3f   : > { %p1201_p8 = pneg %p1200_p6  ;;  %p1205_p13 = por %p1204_p12, %p1203_p10 }
  0x41   : > { %p1206_p0 = pnand %p1205_p13, %p1201_p8 }
  0x43   : > { %1209 = shalt.err (!%p1206_p0)
}
  0x44   : > { %s1210_s30 = scalar_lea.vmem %s262_s11, 2048  ;;  %s1383_s20 = smov [#allocation10]  }
  0x45   : > { %p1211_p3 = scmp.ne.s32.totalorder %s262_s11, %s1210_s30  ;;  %s1215_s2 = sshll.u32 %s1383_s20, 4  ;;  %s1216_s2 = int_to_ptr.vmem [resolvable:$false] %s1215_s2 }
  0x46   : > { %s1217_s7 = scalar_lea.vmem %s1216_s2, 4096  ;;  %p1218_p5 = scmp.lt.s32.totalorder %s262_s11, %s1216_s2 }
  0x47   : > { %p1213_p11 = pnand %p1211_p3, %p1493_p9  ;;  %p1219_p6 = scmp.lt.s32.totalorder %s1217_s7, %s1210_s30 }
  0x49   : > { %p1214_p1 = pneg %p1213_p11  ;;  %p1220_p2 = por %p1219_p6, %p1218_p5 }
  0x4b   : > { %p1221_p4 = pnand %p1220_p2, %p1214_p1 }
  0x4d   : > { %1224 = shalt.err (!%p1221_p4)
}
  0x4e   : > { %s1840_s8 = smov 8   ;;  %s1841_s18 = smov 128  }
  0x4f   : > { %1104 = dma.hbm_to_vmem [thread:$0]  (!%p1481_p7), %s1545_s24, 2048, %s262_s11, %s1487_s17, %s1841_s18, %s1841_s18, %s1840_s8  }
  0x50   : > { %p1842_p11 = scmp.ne.s32.totalorder %s1839_s12, 0  ;;  %s1236_s20 = scalar_lea.vmem %s1537_s15, 128 }
  0x51   : > { %p1237_p10 = scmp.ne.s32.totalorder %s1537_s15, %s1236_s20  ;;  %p1244_p1 = scmp.lt.s32.totalorder %s1537_s15, %s1537_s15 }
  0x52   : > { %p1227_p8 = pneg %p1842_p11  ;;  %p1245_p2 = scmp.lt.s32.totalorder %s1236_s20, %s1236_s20 }
  0x54   : > { %p1239_p12 = pnand %p1237_p10, %p1227_p8  ;;  %p1246_p4 = por %p1245_p2, %p1244_p1 }
  0x56   : > { %p1240_p13 = pneg %p1239_p12 }
  0x58   : > { %p1247_p0 = pnand %p1246_p4, %p1240_p13 }
  0x5a   : > { %1250 = shalt.err (!%p1247_p0)
}
  0x5b   : > { %1097 = dma.hbm_to_vmem [thread:$0]  (!%p1842_p11), %s1817_s1, 128, %s1537_s15, [#allocation6]  }
  0x5c   : > { %s1590_s11 = scalar_lea.hbm %s1821_s5, %s1472_s10  ;;  %s275_s14 = scalar_lea.vmem [#allocation11], %s1470_s9 }
  0x5d   : > { %s284_s13 = sshll.u32 %s275_s14, 4  ;;  %s1843_s12 = sand.u32 1, %s1373_s23   ;;  %s1593_s13 = int_to_ptr.vmem [resolvable:$true] %s284_s13 }
  0x5e   : > { %s272_s21 = scalar_lea.sflag [#allocation12], %s1843_s12  ;;  %s1251_s29 = scalar_lea.hbm %s1590_s11, 2048 }
  0x5f   : > { %p1252_p3 = scmp.ne.s32.totalorder %s1590_s11, %s1251_s29  ;;  %s1256_s20 = scalar_lea.hbm %s1821_s5, 4096 }
  0x60   : > { %p1257_p11 = scmp.lt.s32.totalorder %s1590_s11, %s1821_s5  ;;  %p1258_p8 = scmp.lt.s32.totalorder %s1256_s20, %s1251_s29 }
  0x61   : > { %p1254_p5 = pnand %p1252_p3, %p1493_p9 }
  0x62   : > { %p1259_p10 = por %p1258_p8, %p1257_p11 }
  0x63   : > { %p1255_p6 = pneg %p1254_p5 }
  0x65   : > { %p1260_p12 = pnand %p1259_p10, %p1255_p6 }
  0x67   : > { %1263 = shalt.err (!%p1260_p12)
}
  0x68   : > { %s1264_s9 = scalar_lea.vmem %s1593_s13, 2048  ;;  %s1384_s7 = smov [#allocation11]  }
  0x69   : > { %p1265_p13 = scmp.ne.s32.totalorder %s1593_s13, %s1264_s9  ;;  %s1269_s17 = sshll.u32 %s1384_s7, 4  ;;  %s1270_s17 = int_to_ptr.vmem [resolvable:$false] %s1269_s17 }
  0x6a   : > { %s1271_s24 = scalar_lea.vmem %s1270_s17, 4096  ;;  %p1272_p4 = scmp.lt.s32.totalorder %s1593_s13, %s1270_s17 }
  0x6b   : > { %p1267_p1 = pnand %p1265_p13, %p1493_p9  ;;  %p1273_p0 = scmp.lt.s32.totalorder %s1271_s24, %s1264_s9 }
  0x6d   : > { %p1268_p2 = pneg %p1267_p1  ;;  %p1274_p3 = por %p1273_p0, %p1272_p4 }
  0x6f   : > { %p1275_p5 = pnand %p1274_p3, %p1268_p2 }
  0x71   : > { %1278 = shalt.err (!%p1275_p5)
}
  0x72   : > { %1107 = dma.hbm_to_vmem [thread:$0]  (!%p1481_p7), %s1590_s11, 2048, %s1593_s13, %s272_s21, %s1841_s18, %s1841_s18, %s1840_s8  }
  0x73   : > { %p1844_p9 = scmp.ne.s32.totalorder %s1838_s28, 0 }
  0x74   : > { %p1845_p6 = scmp.eq.s32.totalorder (!%p1844_p9), %s1520_s26, 0 }
  0x75   : > { %296 = sbr.rel (%p1844_p9) target bundleno = 610 (0x262), region = 40 }
  0x7a   : > { %1344 = dma.done.wait (%p1845_p6), [#allocation6], 128   ;;  %p1846_p11 = pmov %p1845_p6 }
  0x7b   : > { %s302_s19 = sand.u32 1, %s1520_s26   ;;  %s304_s16 = sand.u32 1, %s1369_s22  }
  0x7c   : > { %1346 = vsyncadd (%p1846_p11), [#allocation6], 4294967168  ;;  %s897_s14 = sshll.u32 %s304_s16, 7  ;;  %s303_s12 = scalar_lea.sflag [#allocation9], %s302_s19 }
  0x7d   : > { %s1628_s29 = scalar_lea.vmem [#allocation8], %s897_s14  ;;  %p1847_p8 = scmp.ne.s32.totalorder %s1837_s27, 0 }
  0x7f   : > { %1348 = dma.done.wait (%p1847_p8), %s303_s12, 4096  }
  0x80   : > { %1350 = vsyncadd (%p1847_p8), %s303_s12, 4294963200  ;;  %s1634_s28 = scalar_lea.vmem [#allocation10], %s897_s14  ;;  %s321_s8 = scalar_lea.sflag [#allocation12], %s304_s16 }
  0x81   : > { %s1636_s18 = scalar_lea.vmem [#allocation11], %s897_s14 }
  0x82   : > { %1352 = dma.done.wait (%p1847_p8), %s321_s8, 2048  }
  0x83   : > { %1354 = vsyncadd (%p1847_p8), %s321_s8, 4294965248  ;;  %p363_p7 = scmp.lt.s32.totalorder %s1520_s26, 1  ;;  %s1385_s11 = smov [#allocation13]  }
  0x84   : > { %s385_s13 = sshll.u32 %s1385_s11, 4  ;;  %p1848_p12 = pmov %p1845_p6  ;;  %s1644_s13 = int_to_ptr.vmem [resolvable:$true] %s385_s13 }
  0x85   : > { %s364_s21 = scalar_select %p363_p7, %s1520_s26, 1 }
  0x86   : > { %s1649_s15 = scalar_lea.vmem %s1644_s13, 128  ;;  %p1296_p2 = scmp.lt.s32.totalorder %s1644_s13, %s1644_s13 }
  0x87   : > { %s1859_s21 = smov (!%p363_p7, %s364_s21), 1  ;;  %p1290_p10 = scmp.ne.s32.totalorder %s1644_s13, %s1649_s15 }
  0x88   : > { %p1297_p4 = scmp.lt.s32.totalorder %s1649_s15, %s1649_s15 }
  0x89   : > { %p1291_p13 = pnand %p1290_p10, %p1848_p12 }
  0x8a   : > { %p1662_p0 = por %p1297_p4, %p1296_p2 }
  0x8b   : > { %p1292_p1 = pneg %p1291_p13 }
  0x8d   : > { %p1299_p3 = pnand %p1662_p0, %p1292_p1 }
  0x8f   : > { %1302 = shalt.err (!%p1299_p3)  }
  0x90   : > { %p1850_p5 = pmov %p1845_p6  ;;  %s367_s9 = scalar_lea.vmem %s1819_s3, %s1859_s21 }
  0x92   : > { %1088 = dma.hbm_to_vmem [thread:$0]  (%p1850_p5), %s1816_s0, 128, %s1644_s13, [#allocation4] }
  0x93   : > { %p1851_p9 = pmov %p1850_p5 }
  0x94   : > { %p1852_p6 = pmov %p1850_p5 }
  0x95   : > { %1356 = dma.done.wait (%p1851_p9), [#allocation4], 128 }
  0x96   : > { %1358 = vsyncadd (%p1852_p6), [#allocation4], 4294967168  ;;  %v1386_v0 = vmov 0.0   ;;  %vm1387_vm0 = vmmov 0   ;;  %v1388_v1 = vmov 2   ;;  %v1389_v2 = vmov 0  }
  0x97   : > { %972 = vmatprep.subr.mxu0 %v1386_v0  ;;  %1004 = vmatprep.mubr.msk.f32.mxu0 %vm1387_vm0, %v1386_v0  ;;  %v408_v3 = vld [vmem:[%s1628_s29 + $0x78] sm:$0xff]  ;;  %v407_v4 = vld [vmem:[%s1628_s29 + $0x70] sm:$0xff]  ;;  %v406_v5 = vld [vmem:[%s1628_s29 + $0x68] sm:$0xff]  ;;  %v1390_v12 = vmov 3   ;;  %v1391_v14 = vmov 1   ;;  %v1392_v16 = vmov 4  }
  0x98   : > { %1162 = vset.pattern.permute.xlu1 %v1388_v1  ;;  %1160 = vset.pattern.permute.xlu0 %v1389_v2  ;;  %v405_v6 = vld [vmem:[%s1628_s29 + $0x60] sm:$0xff]  ;;  %v488_v7 = vld [vmem:[#allocation5] sm:$0xff]  ;;  %v403_v10 = vld [vmem:[%s1628_s29 + $0x50] sm:$0xff]  ;;  %v1393_v18 = vmov 5   ;;  %v1394_v21 = vmov 6   ;;  %v1395_v23 = vmov 7  }
  0x99   : > { %1007 = vmatprep.subr.mxu1 %v1386_v0  ;;  %1039 = vmatprep.mubr.msk.f32.mxu1 %vm1387_vm0, %v1386_v0  ;;  %v404_v8 = vld [vmem:[%s1628_s29 + $0x58] sm:$0xff]  ;;  %v402_v11 = vld [vmem:[%s1628_s29 + $0x48] sm:$0xff]  ;;  %v401_v13 = vld [vmem:[%s1628_s29 + $0x40] sm:$0xff]  ;;  %p1112_p11 = scmp.eq.s32.totalorder %s1520_s26, 1 }
  0x9a   : > { %973 = vmatpush3.msra.mxu0 %v408_v3  ;;  %514 = vperm.xlu1 %1162, %v488_v7   ;;  %v612_v9 = vld [vmem:[%s1636_s18 + $0x78] sm:$0xff]  ;;  %v399_v17 = vld [vmem:[%s1628_s29 + $0x30] sm:$0xff]  ;;  %v398_v19 = vld [vmem:[%s1628_s29 + $0x28] sm:$0xff] }
  0x9b   : > { %974 = vmatprep.subr.mxu0 %v1386_v0  ;;  %492 = vperm.xlu0 %1160, %v488_v7   ;;  %v400_v15 = vld [vmem:[%s1628_s29 + $0x38] sm:$0xff]  ;;  %v397_v20 = vld [vmem:[%s1628_s29 + $0x20] sm:$0xff]  ;;  %v395_v24 = vld [vmem:[%s1628_s29 + $0x10] sm:$0xff]  ;;  %p1305_p8 = pnand %p1290_p10, %p1112_p11 }
  0x9c   : > { %975 = vmatpush3.msra.mxu0 %v407_v4  ;;  %1008 = vmatpush3.msra.mxu1 %v612_v9  ;;  %v396_v22 = vld [vmem:[%s1628_s29 + $0x18] sm:$0xff]  ;;  %v394_v25 = vld [vmem:[%s1628_s29 + $0x8] sm:$0xff]  ;;  %v393_v26 = vld [vmem:[%s1628_s29] sm:$0xff] }
  0x9d   : > { %976 = vmatprep.subr.mxu0 %v1386_v0  ;;  %1009 = vmatprep.subr.mxu1 %v1386_v0  ;;  %v1720_v27 = vld [vmem:[#allocation13] sm:$0xff]  ;;  %v595_v28 = vld [vmem:[%s1634_s28 + $0x78] sm:$0xff]  ;;  %v594_v29 = vld [vmem:[%s1634_s28 + $0x70] sm:$0xff]  ;;  %p1306_p7 = pneg %p1305_p8 }
  0x9e   : > { %977 = vmatpush3.msra.mxu0 %v406_v5  ;;  %1163 = vset.pattern.permute.xlu1 %v1390_v12  ;;  %v611_v30 = vld [vmem:[%s1636_s18 + $0x70] sm:$0xff]  ;;  %v593_v31 = vld [vmem:[%s1634_s28 + $0x68] sm:$0xff]  ;;  %v592_v33 = vld [vmem:[%s1634_s28 + $0x60] sm:$0xff] }
  0x9f   : > { %978 = vmatprep.subr.mxu0 %v1386_v0  ;;  %525 = vperm.xlu1 %1163, %v488_v7   ;;  %v610_v32 = vld [vmem:[%s1636_s18 + $0x68] sm:$0xff]  ;;  %v609_v34 = vld [vmem:[%s1636_s18 + $0x60] sm:$0xff]  ;;  %v591_v35 = vld [vmem:[%s1634_s28 + $0x58] sm:$0xff]  ;;  %p1313_p12 = pnand %p1306_p7, %p1662_p0 }
  0xa0   : > { %979 = vmatpush3.msra.mxu0 %v405_v6  ;;  %1161 = vset.pattern.permute.xlu0 %v1391_v14  ;;  %v608_v36 = vld [vmem:[%s1636_s18 + $0x58] sm:$0xff]  ;;  %v590_v37 = vld [vmem:[%s1634_s28 + $0x50] sm:$0xff]  ;;  %v589_v39 = vld [vmem:[%s1634_s28 + $0x48] sm:$0xff] }
  0xa1   : > { %980 = vmatprep.subr.mxu0 %v1386_v0  ;;  %503 = vperm.xlu0 %1161, %v488_v7   ;;  %v607_v38 = vld [vmem:[%s1636_s18 + $0x50] sm:$0xff]  ;;  %v606_v40 = vld [vmem:[%s1636_s18 + $0x48] sm:$0xff]  ;;  %v588_v41 = vld [vmem:[%s1634_s28 + $0x40] sm:$0xff] }
  0xa2   : > { %981 = vmatpush3.msra.mxu0 %v404_v8  ;;  %1010 = vmatpush3.msra.mxu1 %v611_v30  ;;  %v605_v42 = vld [vmem:[%s1636_s18 + $0x40] sm:$0xff]  ;;  %v587_v43 = vld [vmem:[%s1634_s28 + $0x38] sm:$0xff]  ;;  %v586_v45 = vld [vmem:[%s1634_s28 + $0x30] sm:$0xff] }
  0xa3   : > { %982 = vmatprep.subr.mxu0 %v1386_v0  ;;  %1164 = vset.pattern.permute.xlu1 %v1392_v16  ;;  %v604_v44 = vld [vmem:[%s1636_s18 + $0x38] sm:$0xff]  ;;  %v603_v46 = vld [vmem:[%s1636_s18 + $0x30] sm:$0xff]  ;;  %v585_v47 = vld [vmem:[%s1634_s28 + $0x28] sm:$0xff] }
  0xa4   : > { %983 = vmatpush3.msra.mxu0 %v403_v10  ;;  %536 = vperm.xlu1 %1164, %v488_v7   ;;  %v602_v48 = vld [vmem:[%s1636_s18 + $0x28] sm:$0xff]  ;;  %v584_v49 = vld [vmem:[%s1634_s28 + $0x20] sm:$0xff]  ;;  %v583_v51 = vld [vmem:[%s1634_s28 + $0x18] sm:$0xff] }
  0xa5   : > { %984 = vmatprep.subr.mxu0 %v1386_v0  ;;  %1165 = vset.pattern.permute.xlu0 %v1393_v18  ;;  %v601_v50 = vld [vmem:[%s1636_s18 + $0x20] sm:$0xff]  ;;  %v600_v52 = vld [vmem:[%s1636_s18 + $0x18] sm:$0xff]  ;;  %v582_v53 = vld [vmem:[%s1634_s28 + $0x10] sm:$0xff] }
  0xa6   : > { %985 = vmatpush3.msra.mxu0 %v402_v11  ;;  %547 = vperm.xlu0 %1165, %v488_v7   ;;  %v599_v54 = vld [vmem:[%s1636_s18 + $0x10] sm:$0xff]  ;;  %v581_v55 = vld [vmem:[%s1634_s28 + $0x8] sm:$0xff]  ;;  %v580_v57 = vld [vmem:[%s1634_s28] sm:$0xff] }
  0xa7   : > { %986 = vmatprep.subr.mxu0 %v1386_v0  ;;  %1011 = vmatprep.subr.mxu1 %v1386_v0  ;;  %v598_v56 = vld [vmem:[%s1636_s18 + $0x8] sm:$0xff]  ;;  %v597_v58 = vld [vmem:[%s1636_s18] sm:$0xff]  ;;  %v904_v59 = vld [vmem:[%s367_s9] ss:$0 sm:$0xff] }
  0xa8   : > { %987 = vmatpush3.msra.mxu0 %v401_v13  ;;  %1166 = vset.pattern.permute.xlu1 %v1394_v21 }
  0xa9   : > { %988 = vmatprep.subr.mxu0 %v1386_v0  ;;  %558 = vperm.xlu1 %1166, %v488_v7  }
  0xaa   : > { %989 = vmatpush3.msra.mxu0 %v400_v15  ;;  %1168 = vset.pattern.permute.xlu0 %v1395_v23 }
  0xab   : > { %990 = vmatprep.subr.mxu0 %v1386_v0  ;;  %1012 = vmatpush3.msra.mxu1 %v610_v32 }
  0xac   : > { %991 = vmatpush3.msra.mxu0 %v399_v17  ;;  %1013 = vmatprep.subr.mxu1 %v1386_v0 }
  0xad   : > { %992 = vmatprep.subr.mxu0 %v1386_v0  ;;  %1167 = vset.pattern.permute.xlu1 %v1395_v23 }
  0xae   : > { %993 = vmatpush3.msra.mxu0 %v398_v19  ;;  %569 = vperm.xlu1 %1167, %v488_v7  }
  0xaf   : > { %994 = vmatprep.subr.mxu0 %v1386_v0  ;;  %1014 = vmatpush3.msra.mxu1 %v609_v34 }
  0xb0   : > { %995 = vmatpush3.msra.mxu0 %v397_v20  ;;  %1015 = vmatprep.subr.mxu1 %v1386_v0 }
  0xb1   : > { %996 = vmatprep.subr.mxu0 %v1386_v0  ;;  %1016 = vmatpush3.msra.mxu1 %v608_v36 }
  0xb2   : > { %997 = vmatpush3.msra.mxu0 %v396_v22  ;;  %1017 = vmatprep.subr.mxu1 %v1386_v0 }
  0xb3   : > { %998 = vmatprep.subr.mxu0 %v1386_v0  ;;  %1018 = vmatpush3.msra.mxu1 %v607_v38 }
  0xb4   : > { %999 = vmatpush3.msra.mxu0 %v395_v24  ;;  %1019 = vmatprep.subr.mxu1 %v1386_v0 }
  0xb5   : > { %1000 = vmatprep.subr.mxu0 %v1386_v0  ;;  %1020 = vmatpush3.msra.mxu1 %v606_v40 }
  0xb6   : > { %1001 = vmatpush3.msra.mxu0 %v394_v25  ;;  %1021 = vmatprep.subr.mxu1 %v1386_v0 }
  0xb7   : > { %1002 = vmatprep.subr.mxu0 %v1386_v0  ;;  %1022 = vmatpush3.msra.mxu1 %v605_v42 }
  0xb8   : > { %1003 = vmatpush3.msra.mxu0 %v393_v26  ;;  %1023 = vmatprep.subr.mxu1 %v1386_v0 }
  0xb9   : > { %1005 = vmatmul.mubr.f32.vlgmr.msra.gmra.mxu0 %v1720_v27  ;;  %1042 = vmatprep.subr.mxu0 %v1386_v0 }
  0xba   : > { %1043 = vmatpush3.msra.mxu0 %v595_v28  ;;  %1074 = vmatprep.mubr.msk.f32.mxu0 %vm1387_vm0, %v1386_v0 }
  0xbb   : > { %1044 = vmatprep.subr.mxu0 %v1386_v0  ;;  %1024 = vmatpush3.msra.mxu1 %v604_v44 }
  0xbc   : > { %1045 = vmatpush3.msra.mxu0 %v594_v29  ;;  %1025 = vmatprep.subr.mxu1 %v1386_v0 }
  0xbd   : > { %1046 = vmatprep.subr.mxu0 %v1386_v0  ;;  %1026 = vmatpush3.msra.mxu1 %v603_v46 }
  0xbe   : > { %1047 = vmatpush3.msra.mxu0 %v593_v31  ;;  %1027 = vmatprep.subr.mxu1 %v1386_v0 }
  0xbf   : > { %1048 = vmatprep.subr.mxu0 %v1386_v0  ;;  %1028 = vmatpush3.msra.mxu1 %v602_v48 }
  0xc0   : > { %1049 = vmatpush3.msra.mxu0 %v592_v33  ;;  %1029 = vmatprep.subr.mxu1 %v1386_v0 }
  0xc1   : > { %1050 = vmatprep.subr.mxu0 %v1386_v0  ;;  %1030 = vmatpush3.msra.mxu1 %v601_v50 }
  0xc2   : > { %1051 = vmatpush3.msra.mxu0 %v591_v35  ;;  %1031 = vmatprep.subr.mxu1 %v1386_v0 }
  0xc3   : > { %1052 = vmatprep.subr.mxu0 %v1386_v0  ;;  %1032 = vmatpush3.msra.mxu1 %v600_v52 }
  0xc4   : > { %1053 = vmatpush3.msra.mxu0 %v590_v37  ;;  %1033 = vmatprep.subr.mxu1 %v1386_v0 }
  0xc5   : > { %1054 = vmatprep.subr.mxu0 %v1386_v0  ;;  %1034 = vmatpush3.msra.mxu1 %v599_v54 }
  0xc6   : > { %1055 = vmatpush3.msra.mxu0 %v589_v39  ;;  %1035 = vmatprep.subr.mxu1 %v1386_v0 }
  0xc7   : > { %1056 = vmatprep.subr.mxu0 %v1386_v0  ;;  %1036 = vmatpush3.msra.mxu1 %v598_v56 }
  0xc8   : > { %1057 = vmatpush3.msra.mxu0 %v588_v41  ;;  %1037 = vmatprep.subr.mxu1 %v1386_v0 }
  0xc9   : > { %1058 = vmatprep.subr.mxu0 %v1386_v0  ;;  %1038 = vmatpush3.msra.mxu1 %v597_v58 }
  0xca   : > { %1059 = vmatpush3.msra.mxu0 %v587_v43 }
  0xcb   : > { %1060 = vmatprep.subr.mxu0 %v1386_v0 }
  0xcc   : > { %1061 = vmatpush3.msra.mxu0 %v586_v45 }
  0xcd   : > { %1062 = vmatprep.subr.mxu0 %v1386_v0 }
  0xce   : > { %1063 = vmatpush3.msra.mxu0 %v585_v47 }
  0xcf   : > { %1064 = vmatprep.subr.mxu0 %v1386_v0 }
  0xd0   : > { %1065 = vmatpush3.msra.mxu0 %v584_v49 }
  0xd1   : > { %1066 = vmatprep.subr.mxu0 %v1386_v0 }
  0xd2   : > { %1067 = vmatpush3.msra.mxu0 %v583_v51 }
  0xd3   : > { %1068 = vmatprep.subr.mxu0 %v1386_v0 }
  0xd4   : > { %1069 = vmatpush3.msra.mxu0 %v582_v53 }
  0xd5   : > { %1070 = vmatprep.subr.mxu0 %v1386_v0 }
  0xd6   : > { %1071 = vmatpush3.msra.mxu0 %v581_v55 }
  0xd7   : > { %1072 = vmatprep.subr.mxu0 %v1386_v0 }
  0xd8   : > { %1073 = vmatpush3.msra.mxu0 %v580_v57 }
  0xd9   : > { %1075 = vmatmul.mubr.f32.vlgmr.msra.gmra.mxu0 %v1720_v27 }
 0x115   : > { %v515_v60 = vpop.permute.xlu1 %514 }
 0x116   : > { %v493_v3 = vpop.permute.xlu0 %492 }
 0x11a   : > { %v526_v2 = vpop.permute.xlu1 %525 }
 0x11c   : > { %v504_v7 = vpop.permute.xlu0 %503 }
 0x11f   : > { %v537_v4 = vpop.permute.xlu1 %536 }
 0x121   : > { %v548_v18 = vpop.permute.xlu0 %547 }
 0x124   : > { %v559_v15 = vpop.permute.xlu1 %558 }
 0x129   : > { %v570_v25 = vpop.permute.xlu1 %569 }
 0x179   : > { %v482_v61 = vpop.f32.mrf.mxu0 }
 0x17a   : > { %v483_v62 = vadd.f32 %v904_v59, %v482_v61 }
 0x17b   : > { %v1006_v63 = vpop.f32.mrf.mxu0 }
 0x17c   : > { %v486_v1 = vmax.f32 %v483_v62, 0.0 }
 0x17e   : > { %487 = vst [vmem:[#allocation2] sm:$0xff] %v486_v1 }
 0x185   : > { %v905_v5 = vld [vmem:[#allocation2] ss:$0 sm:$0xff]  ;;  %v906_v0 = vld [vmem:[#allocation2 + $0x1] ss:$0 sm:$0xff]  ;;  %v907_v8 = vld [vmem:[#allocation2 + $0x2] ss:$0 sm:$0xff] }
 0x186   : > { %v499_v6 = vmul.f32 %v905_v5, %v493_v3  ;;  %v510_v10 = vmul.f32 %v906_v0, %v504_v7  ;;  %v908_v11 = vld [vmem:[#allocation2 + $0x3] ss:$0 sm:$0xff]  ;;  %v521_v13 = vmul.f32 %v907_v8, %v515_v60  ;;  %v909_v14 = vld [vmem:[#allocation2 + $0x4] ss:$0 sm:$0xff]  ;;  %v910_v19 = vld [vmem:[#allocation2 + $0x5] ss:$0 sm:$0xff] }
 0x187   : > { %v532_v17 = vmul.f32 %v908_v11, %v526_v2  ;;  %v543_v20 = vmul.f32 %v909_v14, %v537_v4  ;;  %v911_v22 = vld [vmem:[#allocation2 + $0x6] ss:$0 sm:$0xff]  ;;  %v554_v24 = vmul.f32 %v910_v19, %v548_v18  ;;  %v912_v26 = vld [vmem:[#allocation2 + $0x7] ss:$0 sm:$0xff] }
 0x188   : > { %v500_v9 = vmax.f32 %v499_v6, 0.0  ;;  %v565_v27 = vmul.f32 %v911_v22, %v559_v15  ;;  %v576_v29 = vmul.f32 %v912_v26, %v570_v25 }
 0x18a   : > { %v511_v12 = vmax.f32 %v500_v9, %v510_v10 }
 0x18c   : > { %v522_v16 = vmax.f32 %v511_v12, %v521_v13 }
 0x18e   : > { %v533_v21 = vmax.f32 %v522_v16, %v532_v17 }
 0x190   : > { %v544_v23 = vmax.f32 %v533_v21, %v543_v20 }
 0x192   : > { %v555_v28 = vmax.f32 %v544_v23, %v554_v24 }
 0x194   : > { %v566_v30 = vmax.f32 %v555_v28, %v565_v27 }
 0x196   : > { %v577_v31 = vmax.f32 %v566_v30, %v576_v29 }
 0x198   : > { %1040 = vmatmul.mubr.f32.vlgmr.msra.gmra.mxu1 %v577_v31 }
 0x199   : > { %v749_v32 = vpop.f32.mrf.mxu0 }
 0x19b   : > { %v1076_v33 = vpop.f32.mrf.mxu0 }
 0x258   : > { %v679_v34 = vpop.f32.mrf.mxu1 }
 0x259   : > { %v750_v35 = vadd.f32 %v749_v32, %v679_v34 }
 0x25a   : > { %v1041_v36 = vpop.f32.mrf.mxu1 }
 0x25b   : > { %v753_v37 = vmax.f32 %v750_v35, 0.0 }
 0x25d   : > { %754 = vst [vmem:[#allocation13] sm:$0xff] %v753_v37 }
 0x25e   : > { %1316 = shalt.err (!%p1313_p12)
}
 0x25f   : > { %1091 = dma.vmem_to_hbm [thread:$0]  (%p1112_p11), %s1644_s13, 128, %s1822_s6, [#allocation7]  }
 0x260   : > { %1360 = dma.done.wait (%p1112_p11), [#allocation7], 128  }
 0x261   : > { %1362 = vsyncadd (%p1112_p11), [#allocation7], 4294967168 }
 0x262 PF: > { %s1853_s26 = sld [smem:[#allocation23_spill]]  ;;  %p21_p13 = scmp.ge.s32.totalorder %s1452_s25, 4  }
 0x263   : > { %s1854_s21 = smov %s1369_s22  ;;  %s1855_s22 = smov %s1373_s23 }
 0x264   : > { %s1857_s24 = smov %s1452_s25  ;;  %23 = sbr.rel (!%p21_p13) target bundleno = 9 (0x9), region = 117 }
 0x268   : > { %s1856_s23 = smov %s1853_s26 }
 0x269   :  { %775 = vsyncpa [#allocation6], 1 }
 0x26a   :  { %777 = vsyncpa [#allocation6 + $0x1], 1 }
 0x26b   :  { %778 = vsyncpa [#allocation9], 1 }
 0x26c   :  { %780 = vsyncpa [#allocation9 + $0x1], 1 }
 0x26d   :  { %781 = vsyncpa [#allocation12], 1 }
 0x26e   :  { %783 = vsyncpa [#allocation12 + $0x1], 1 }
 0x26f   :  { %784 = vsyncpa [#allocation7], 1 }
 0x270   :  { %786 = vsyncpa [#allocation7 + $0x1], 1 }
 0x271   :  { %787 = vsyncmov [#allocation4] }
 0x274   :  { %s788_s16 = vpop.sfrf %787 }
 0x275   :  { %p917_p10 = scmp.ne.s32.totalorder %s788_s16, 0 }
 0x277   :  { %792 = shalt.err (%p917_p10)  }

</bundles_post_ra>
